<compile_context>
chip_gen: v7x
topology: tpu7x:2x2x1
jax: 0.10.0
libtpu: 0.0.40
codegen_flags: <defaults>
</compile_context>

<pallas_src>
import functools

import jax
import jax.numpy as jnp
from jax.experimental import pallas as pl
from jax.experimental.pallas import tpu as pltpu

_LANES = 128
_MAX_ROW_TILE = 8192          # 8192 x 128 f32 = 4 MiB per input per pipeline buffer
_VMEM_LIMIT_BYTES = 40 << 20  # 2 inputs x 2 buffers at max tile, with headroom


def _sublane_align(dtype):
    """Second-to-last-dim tile multiple for a dtype: f32->8, bf16->16, int8->32."""
    itemsize = jnp.dtype(dtype).itemsize
    return max(8, 8 * (4 // max(itemsize, 1)))


def _round_up(x, m):
    return ((x + m - 1) // m) * m


def _weighted_bce(p, t, pos_weight, binary_targets):
    """Elementwise weight * BCE; p, t already float32.

    Note: torch computes the (1-t) term with log1p(-p); log(1-p) differs only
    in ulps for p << 1 and keeps the Mosaic lowering simple.
    """
    if binary_targets:
        # Single EUP log per element; only valid when targets are exactly {0,1}.
        bce = -jnp.maximum(jnp.log(jnp.where(t == 1.0, p, 1.0 - p)), -100.0)
    else:
        bce = -(t * jnp.maximum(jnp.log(p), -100.0)
                + (1.0 - t) * jnp.maximum(jnp.log(1.0 - p), -100.0))
    w = jnp.where(t == 1.0, jnp.float32(pos_weight), jnp.float32(1.0))
    return w * bce


def _wbce_kernel(pred_ref, tgt_ref, out_ref, *, pos_weight, binary_targets,
                 needs_row_mask, valid_rows_in_last):
    # Stream native dtype from HBM; upcast on the VPU (hidden under HBM bound).
    p = pred_ref[...].astype(jnp.float32)
    t = tgt_ref[...].astype(jnp.float32)

    wb = _weighted_bce(p, t, pos_weight, binary_targets)

    # Lane-dense (1, 128) partial sums per block; the tiny final reduction
    # (num_blocks x 128 elements) runs in the wrapper.
    out_ref[...] = jnp.sum(wb, axis=0, keepdims=True)

    if needs_row_mask:
        # Only the last block over-covers the (rows, 128) slab; redo its sum
        # with out-of-range rows selected to zero (select, not multiply, so
        # garbage/NaN padding never reaches the sum).
        @pl.when(pl.program_id(0) == pl.num_programs(0) - 1)
        def _():
            rid = jax.lax.broadcasted_iota(jnp.int32, wb.shape, 0)
            wb_masked = jnp.where(rid < valid_rows_in_last, wb, 0.0)
            out_ref[...] = jnp.sum(wb_masked, axis=0, keepdims=True)


def weighted_loss(pred, target, pos_weight=5.0, *, binary_targets=False,
                  max_row_tile=_MAX_ROW_TILE):
    """Pallas implementation of WeightedLoss.forward. Returns a float32 scalar."""
    assert pred.shape == target.shape
    total_n = int(pred.size)
    assert total_n > 0

    # reshape only: no dtype conversion, no padding (metadata-only when contiguous).
    p_flat = pred.reshape(-1)
    t_flat = target.reshape(-1)

    rows = total_n // _LANES
    rem = total_n % _LANES

    total = jnp.float32(0.0)

    if rows > 0:
        n_main = rows * _LANES
        if rem:
            # 128-aligned prefix goes through the kernel; the <128-element tail
            # is handled below with plain jnp (no full-array jnp.pad pass).
            p_main, t_main = p_flat[:n_main], t_flat[:n_main]
        else:
            p_main, t_main = p_flat, t_flat
        p2 = p_main.reshape(rows, _LANES)
        t2 = t_main.reshape(rows, _LANES)

        align = max(_sublane_align(p2.dtype), _sublane_align(t2.dtype))
        max_tile = max(align, (int(max_row_tile) // align) * align)
        if rows <= align:
            row_tile = rows  # single full-extent block (no alignment requirement)
        else:
            # Aim for >= 2 blocks so the "parallel" grid splits across both
            # TensorCores on v7x, capped by the VMEM-sized max tile.
            row_tile = min(max_tile, _round_up(pl.cdiv(rows, 2), align))
        num_blocks = pl.cdiv(rows, row_tile)
        needs_row_mask = (rows % row_tile) != 0
        valid_rows_in_last = rows - (num_blocks - 1) * row_tile

        kernel = functools.partial(
            _wbce_kernel,
            pos_weight=float(pos_weight),
            binary_targets=bool(binary_targets),
            needs_row_mask=needs_row_mask,
            valid_rows_in_last=valid_rows_in_last,
        )

        in_spec = pl.BlockSpec((row_tile, _LANES), lambda i: (i, 0))
        out_spec = pl.BlockSpec((None, 1, _LANES), lambda i: (i, 0, 0))

        partials = pl.pallas_call(
            kernel,
            out_shape=jax.ShapeDtypeStruct((num_blocks, 1, _LANES), jnp.float32),
            grid_spec=pltpu.PrefetchScalarGridSpec(
                num_scalar_prefetch=0,
                grid=(num_blocks,),
                in_specs=[in_spec, in_spec],
                out_specs=out_spec,
            ),
            compiler_params=pltpu.CompilerParams(
                dimension_semantics=("parallel",),
                vmem_limit_bytes=_VMEM_LIMIT_BYTES,
            ),
        )(p2, t2)

        total = total + jnp.sum(partials)

    if rem:
        tp = p_flat[rows * _LANES:].astype(jnp.float32)
        tt = t_flat[rows * _LANES:].astype(jnp.float32)
        total = total + jnp.sum(
            _weighted_bce(tp, tt, float(pos_weight), bool(binary_targets)))

    return total / jnp.float32(total_n)


def _reference(pred, target, pos_weight=5.0):
    p = pred.astype(jnp.float32)
    t = target.astype(jnp.float32)
    bce = -(t * jnp.maximum(jnp.log(p), -100.0)
            + (1.0 - t) * jnp.maximum(jnp.log(1.0 - p), -100.0))
    w = jnp.where(t == 1.0, jnp.float32(pos_weight), jnp.float32(1.0))
    return jnp.mean(w * bce)


if __name__ == "__main__":
    root = jax.random.PRNGKey(0)

    def make_inputs(seed, shape, pred_dtype=jnp.float32, target_dtype=jnp.float32):
        k1, k2 = jax.random.split(jax.random.fold_in(root, seed))
        pred = jax.nn.sigmoid(jax.random.normal(k1, shape, dtype=jnp.float32))
        target = (jax.random.uniform(k2, shape) < 0.2).astype(jnp.float32)
        return pred.astype(pred_dtype), target.astype(target_dtype)

    def check(loss, ref, tag):
        loss = jax.block_until_ready(loss)
        assert jnp.allclose(loss, ref, rtol=1e-5, atol=1e-6), (tag, loss, ref)

    # 1) Primary: NCHW-like sigmoid predictions vs. binary anomaly labels;
    #    lane-aligned, two blocks (megacore-splittable), zero wrapper copies.
    pred, target = make_inputs(0, (2, 4, 16, 16))
    check(weighted_loss(pred, target, pos_weight=5.0),
          _reference(pred, target, 5.0), "primary")

    # 2) Single-log path for strictly binary targets.
    check(weighted_loss(pred, target, pos_weight=5.0, binary_targets=True),
          _reference(pred, target, 5.0), "binary_single_log")

    # 3) bf16 predictions streamed natively, upcast in-kernel (16-row alignment).
    pred_bf, target_f = make_inputs(1, (2, 4, 32, 32), pred_dtype=jnp.bfloat16)
    check(weighted_loss(pred_bf, target_f, pos_weight=5.0),
          _reference(pred_bf, target_f, 5.0), "bf16_inputs")

    # 4) Tail-only ragged input (< 128 elements): pure jnp path.
    pred2, target2 = make_inputs(2, (3, 5, 7))
    check(weighted_loss(pred2, target2, pos_weight=3.0),
          _reference(pred2, target2, 3.0), "tail_only")

    # 5) Ragged input exercising both the kernel prefix and the jnp tail.
    pred3, target3 = make_inputs(3, (3, 5, 9))
    check(weighted_loss(pred3, target3, pos_weight=3.0),
          _reference(pred3, target3, 3.0), "ragged_mixed")

    # 6) Multi-block + in-kernel last-block row mask (small tile forced).
    pred4, target4 = make_inputs(4, (2, 4, 16, 17))   # 17 rows of 128
    check(weighted_loss(pred4, target4, pos_weight=5.0, max_row_tile=8),
          _reference(pred4, target4, 5.0), "row_mask")

    print("KERNEL_OK")
</pallas_src>

<mosaic_0001>
module attributes {stable_mosaic.version = 11 : i64} {
  func.func @_wbce_kernel(%arg0: i32, %arg1: memref<8x128xf32, #tpu.memory_space<vmem>>, %arg2: memref<8x128xf32, #tpu.memory_space<vmem>>, %arg3: memref<1x1x128xf32, #tpu.memory_space<vmem>>) attributes {dimension_semantics = [#tpu.dimension_semantics<parallel>], iteration_bounds = array<i64: 2>, scalar_prefetch = 0 : i64, scratch_operands = 0 : i64, tpu.core_type = #tpu.core_type<tc>, window_params = [{transform_indices = @transform_0, window_bounds = array<i64: 8, 128>}, {transform_indices = @transform_1, window_bounds = array<i64: 8, 128>}, {transform_indices = @transform_2, window_bounds = array<i64: 1, 1, 128>}]} {
    %c0 = arith.constant 0 : index
    %c0_0 = arith.constant 0 : index
    %0 = vector.load %arg1[%c0, %c0_0] : memref<8x128xf32, #tpu.memory_space<vmem>>, vector<8x128xf32>
    %c0_1 = arith.constant 0 : index
    %c0_2 = arith.constant 0 : index
    %1 = vector.load %arg2[%c0_1, %c0_2] : memref<8x128xf32, #tpu.memory_space<vmem>>, vector<8x128xf32>
    %2 = math.log %0 : vector<8x128xf32>
    %cst = arith.constant -1.000000e+02 : f32
    %3 = vector.broadcast %cst : f32 to vector<8x128xf32>
    %4 = arith.maximumf %2, %3 : vector<8x128xf32>
    %5 = arith.mulf %1, %4 : vector<8x128xf32>
    %cst_3 = arith.constant 1.000000e+00 : f32
    %6 = vector.broadcast %cst_3 : f32 to vector<8x128xf32>
    %7 = arith.subf %6, %1 : vector<8x128xf32>
    %cst_4 = arith.constant 1.000000e+00 : f32
    %8 = vector.broadcast %cst_4 : f32 to vector<8x128xf32>
    %9 = arith.subf %8, %0 : vector<8x128xf32>
    %10 = math.log %9 : vector<8x128xf32>
    %cst_5 = arith.constant -1.000000e+02 : f32
    %11 = vector.broadcast %cst_5 : f32 to vector<8x128xf32>
    %12 = arith.maximumf %10, %11 : vector<8x128xf32>
    %13 = arith.mulf %7, %12 : vector<8x128xf32>
    %14 = arith.addf %5, %13 : vector<8x128xf32>
    %cst_6 = arith.constant 0.000000e+00 : f32
    %15 = vector.broadcast %cst_6 : f32 to vector<8x128xf32>
    %16 = arith.subf %15, %14 : vector<8x128xf32>
    %cst_7 = arith.constant 1.000000e+00 : f32
    %17 = vector.broadcast %cst_7 : f32 to vector<8x128xf32>
    %18 = arith.cmpf oeq, %1, %17 : vector<8x128xf32>
    %cst_8 = arith.constant 5.000000e+00 : f32
    %cst_9 = arith.constant 1.000000e+00 : f32
    %19 = vector.broadcast %cst_8 : f32 to vector<8x128xf32>
    %20 = vector.broadcast %cst_9 : f32 to vector<8x128xf32>
    %21 = arith.select %18, %19, %20 : vector<8x128xi1>, vector<8x128xf32>
    %22 = arith.mulf %21, %16 : vector<8x128xf32>
    %cst_10 = arith.constant dense<0.000000e+00> : vector<128xf32>
    %23 = vector.multi_reduction <add>, %22, %cst_10 [0] : vector<8x128xf32> to vector<128xf32>
    %24 = vector.shape_cast %23 : vector<128xf32> to vector<1x128xf32>
    %c0_11 = arith.constant 0 : index
    %c0_12 = arith.constant 0 : index
    %c0_13 = arith.constant 0 : index
    %25 = vector.load %arg3[%c0_11, %c0_12, %c0_13] : memref<1x1x128xf32, #tpu.memory_space<vmem>>, vector<1x1x128xf32>
    %26 = vector.shape_cast %25 : vector<1x1x128xf32> to vector<1x128xf32>
    %27 = vector.shape_cast %24 : vector<1x128xf32> to vector<1x1x128xf32>
    tpu.vector_store %arg3[%c0_11, %c0_12, %c0_13], %27 {strides = array<i32>} : memref<1x1x128xf32, #tpu.memory_space<vmem>>, vector<1x1x128xf32>,
    return
  }
  func.func @transform_0(%arg0: i32) -> (i32, i32) {
    %c0_i32 = arith.constant 0 : i32
    %c0_i32_0 = arith.constant 0 : i32
    return %arg0, %c0_i32 : i32, i32
  }
  func.func @transform_1(%arg0: i32) -> (i32, i32) {
    %c0_i32 = arith.constant 0 : i32
    %c0_i32_0 = arith.constant 0 : i32
    return %arg0, %c0_i32 : i32, i32
  }
  func.func @transform_2(%arg0: i32) -> (i32, i32, i32) {
    %c0_i32 = arith.constant 0 : i32
    %c0_i32_0 = arith.constant 0 : i32
    %c0_i32_1 = arith.constant 0 : i32
    return %arg0, %c0_i32, %c0_i32_0 : i32, i32, i32
  }
}

</mosaic_0001>

<bundles_post_ra>
// kernel: tpu_custom_call.1
= control target key start
LH: loop header
LB: loop body
LE: loop exit
PB: predicated region body
PF: predicated region fallthrough
CT: control target
= control target key end

     0   :  { %7 = vsyncpa [#allocation3], 0  ;;  %s751_s0 = inlined_call_operand.hbm [shape: f32[16,128], index: 0, kind: input, shape index: {}]   ;;  %s752_s1 = inlined_call_operand.hbm [shape: f32[16,128], index: 1, kind: input, shape index: {}]   ;;  %s753_s2 = inlined_call_operand.hbm [shape: f32[2,1,128], index: 2, kind: output, shape index: {}]  }
   0x1   :  { %9 = vsyncpa [#allocation3 + $0x1], 0 }
   0x2   :  { %10 = vsyncpa [#allocation6], 0 }
   0x3   :  { %12 = vsyncpa [#allocation6 + $0x1], 0 }
   0x4   :  { %13 = vsyncpa [#allocation4], 0 }
   0x5   :  { %15 = vsyncpa [#allocation4 + $0x1], 0  ;;  %s541_s9 = smov 0   ;;  %s543_s10 = smov 0  }
   0x6   :  { %s545_s11 = smov 0   ;;  %s547_s12 = smov 0  }
   0x7 LB: > { %s562_s13 = sadd.s32 4294967295, %s520_s12   ;;  %s321_s14 = sadd.s32 4294967294, %s520_s12   ;;  %s520_s12 = sphi %s547_s12, %s772_s12   ;;  %s516_s11 = sphi %s545_s11, %s771_s11   ;;  %s512_s10 = sphi %s543_s10, %s770_s10   ;;  %s508_s9 = sphi %s541_s9, %s769_s9  }
   0x8   : > { %s566_s15 = sadd.s32 1, %s520_s12   ;;  %s28_s16 = sadd.s32 1, %s516_s11 }
   0x9   : > { %s25_s17 = ssub.s32 %s520_s12, %s566_s15  ;;  %p35_p0 = scmp.ne.s32.totalorder %s516_s11, %s512_s10 }
   0xa   : > { %p26_p1 = scmp.eq.s32.totalorder %s25_s17, 0  ;;  %p36_p2 = scmp.eq.s32.totalorder %s520_s12, 0 }
   0xb   : > { %p41_p3 = scmp.ne.s32.totalorder %s512_s10, %s508_s9  ;;  %p42_p4 = scmp.eq.s32.totalorder %s562_s13, 0 }
   0xc   : > { %s578_s18 = scalar_select %p26_p1, %s516_s11, %s28_s16  }
   0xd   : > { %p580_p5 = por %p36_p2, %p35_p0  ;;  %p584_p6 = por %p42_p4, %p41_p3 }
   0xe   : > { %p91_p7 = scmp.eq.s32.totalorder %s562_s13, 1  ;;  %p97_p8 = scmp.eq.s32.totalorder %s321_s14, 1 }
   0xf   : > { %s757_s20 = scalar_select %p584_p6, 1, 0 }
  0x10   : > { %p351_p10 = scmp.lt.s32.totalorder %s520_s12, 2  ;;  %p591_p11 = por %p91_p7, %p35_p0 }
  0x11   : > { %p595_p12 = por %p97_p8, %p41_p3  ;;  %s600_s23 = sand.u32 1, %s516_s11  }
  0x12   : > { %s758_s21 = scalar_select %p591_p11, 1, 0 }
  0x13   : > { %s759_s22 = scalar_select %p595_p12, 1, 0 }
  0x14   : > { %s325_s24 = sshll.u32 %s520_s12, 7  ;;  %s324_s25 = sshll.u32 %s600_s23, 3 }
  0x15   : > { %s609_s28 = scalar_lea.hbm %s751_s0, %s325_s24  ;;  %s121_s29 = scalar_lea.vmem [#allocation2], %s324_s25 }
  0x16   : > { %s128_s30 = sshll.u32 %s121_s29, 4  ;;  %p615_p13 = pnand %p351_p10, %p580_p5  ;;  %s619_s30 = int_to_ptr.vmem [resolvable:$true] %s128_s30 }
  0x17   : > { %s118_s4 = scalar_lea.sflag [#allocation3], %s600_s23  ;;  %s390_s5 = scalar_lea.hbm %s609_s28, 128 }
  0x18   : > { %p391_p2 = scmp.ne.s32.totalorder %s609_s28, %s390_s5  ;;  %p392_p3 = pneg %p615_p13 }
  0x19   : > { %s395_s8 = scalar_lea.hbm %s751_s0, 256  ;;  %p396_p5 = scmp.lt.u32.totalorder %s609_s28, %s751_s0 }
  0x1a   : > { %p393_p4 = pnand %p392_p3, %p391_p2  ;;  %p397_p8 = scmp.lt.u32.totalorder %s395_s8, %s390_s5 }
  0x1b   : > { %p399_p9 = scmp.lt.u32.totalorder %s390_s5, %s609_s28 }
  0x1c   : > { %p394_p7 = pneg %p393_p4  ;;  %p398_p10 = por %p397_p8, %p396_p5 }
  0x1e   : > { %p400_p0 = por %p399_p9, %p398_p10 }
  0x20   : > { %p401_p1 = pnand %p400_p0, %p394_p7 }
  0x22   : > { %404 = shalt.err (!%p401_p1)
}
  0x23   : > { %s405_s17 = scalar_lea.vmem %s619_s30, 128  ;;  %s522_s19 = smov [#allocation2]  }
  0x24   : > { %p406_p2 = scmp.ne.s32.totalorder %s619_s30, %s405_s17  ;;  %s410_s26 = sshll.u32 %s522_s19, 4  ;;  %s411_s26 = int_to_ptr.vmem [resolvable:$false] %s410_s26 }
  0x25   : > { %s412_s27 = scalar_lea.vmem %s411_s26, 256  ;;  %p413_p11 = scmp.lt.s32.totalorder %s619_s30, %s411_s26 }
  0x26   : > { %p408_p4 = pnand %p406_p2, %p392_p3  ;;  %p414_p5 = scmp.lt.s32.totalorder %s412_s27, %s405_s17 }
  0x28   : > { %p409_p12 = pneg %p408_p4  ;;  %p415_p8 = por %p414_p5, %p413_p11 }
  0x2a   : > { %p416_p9 = pnand %p415_p8, %p409_p12 }
  0x2c   : > { %419 = shalt.err (!%p416_p9)
}
  0x2d   : > { %343 = dma.hbm_to_vmem [thread:$0]  (!%p615_p13), %s609_s28, 128, %s619_s30, %s118_s4  }
  0x2e   : > { %p761_p0 = scmp.lt.s32.totalorder %s520_s12, 3  ;;  %p762_p1 = scmp.ge.s32.totalorder %s520_s12, 1 }
  0x2f   : > { %s662_s7 = scalar_lea.hbm %s752_s1, %s325_s24  ;;  %s139_s8 = scalar_lea.vmem [#allocation5], %s324_s25 }
  0x30   : > { %p653_p7 = pnand %p762_p1, %p761_p0  ;;  %s146_s14 = sshll.u32 %s139_s8, 4  ;;  %s147_s14 = int_to_ptr.vmem [resolvable:$true] %s146_s14 }
  0x31   : > { %s136_s28 = scalar_lea.sflag [#allocation6], %s600_s23  ;;  %s420_s30 = scalar_lea.hbm %s662_s7, 128 }
  0x32   : > { %s763_s29 = scalar_select %p653_p7, 1, 0 }
  0x33   : > { %p421_p11 = scmp.ne.s32.totalorder %s662_s7, %s420_s30  ;;  %s425_s24 = scalar_lea.hbm %s752_s1, 256 }
  0x34   : > { %p426_p2 = scmp.lt.u32.totalorder %s662_s7, %s752_s1  ;;  %p427_p4 = scmp.lt.u32.totalorder %s425_s24, %s420_s30 }
  0x35   : > { %p423_p12 = pnand %p421_p11, %p392_p3  ;;  %p429_p8 = scmp.lt.u32.totalorder %s420_s30, %s662_s7 }
  0x36   : > { %p428_p5 = por %p427_p4, %p426_p2 }
  0x37   : > { %p424_p10 = pneg %p423_p12 }
  0x38   : > { %p430_p9 = por %p429_p8, %p428_p5 }
  0x3a   : > { %p431_p0 = pnand %p430_p9, %p424_p10 }
  0x3c   : > { %434 = shalt.err (!%p431_p0)
}
  0x3d   : > { %s435_s23 = scalar_lea.vmem %s147_s14, 128  ;;  %s523_s25 = smov [#allocation5]  }
  0x3e   : > { %p436_p1 = scmp.ne.s32.totalorder %s147_s14, %s435_s23  ;;  %s440_s26 = sshll.u32 %s523_s25, 4  ;;  %s441_s26 = int_to_ptr.vmem [resolvable:$false] %s440_s26 }
  0x3f   : > { %s442_s27 = scalar_lea.vmem %s441_s26, 256  ;;  %p443_p6 = scmp.lt.s32.totalorder %s147_s14, %s441_s26 }
  0x40   : > { %p438_p11 = pnand %p436_p1, %p392_p3  ;;  %p444_p7 = scmp.lt.s32.totalorder %s442_s27, %s435_s23 }
  0x42   : > { %p439_p12 = pneg %p438_p11  ;;  %p445_p2 = por %p444_p7, %p443_p6 }
  0x44   : > { %p446_p4 = pnand %p445_p2, %p439_p12 }
  0x46   : > { %449 = shalt.err (!%p446_p4)
}
  0x47   : > { %346 = dma.hbm_to_vmem [thread:$0]  (!%p615_p13), %s662_s7, 128, %s147_s14, %s136_s28  }
  0x48   : > { %p764_p10 = scmp.ne.s32.totalorder %s763_s29, 0 }
  0x49   : > { %s689_s5 = sand.u32 (!%p764_p10), 1, %s512_s10   ;;  %p765_p3 = scmp.ne.s32.totalorder (!%p764_p10), %s757_s20, 0 }
  0x4a   : > { %155 = sbr.rel (%p764_p10) target bundleno = 136 (0x88), region = 28  ;;  %s329_s6 = sshll.u32 (!%p764_p10), %s689_s5, 3 }
  0x4b   : > { %s158_s8 = scalar_lea.sflag (!%p764_p10), [#allocation3], %s689_s5  ;;  %s161_s30 = scalar_lea.vmem (!%p764_p10), [#allocation2], %s329_s6 }
  0x51   : > { %495 = dma.done.wait (%p765_p3), %s158_s8, 128  }
  0x52   : > { %497 = vsyncadd (%p765_p3), %s158_s8, 4294967168  ;;  %s167_s3 = scalar_lea.sflag [#allocation6], %s689_s5  ;;  %s170_s7 = scalar_lea.vmem [#allocation5], %s329_s6 }
  0x53   : > { %499 = dma.done.wait (%p765_p3), %s167_s3, 128  }
  0x54   : > { %501 = vsyncadd (%p765_p3), %s167_s3, 4294967168  ;;  %v195_v0 = vld [vmem:[%s161_s30] sm:$0xff]  ;;  %v196_v3 = vld [vmem:[%s170_s7] sm:$0xff]  ;;  %v524_v13 = vmov 1.0   ;;  %s194_s20 = scalar_lea.vmem [#allocation7], %s689_s5  ;;  %s331_s14 = sshll.u32 %s562_s13, 4 }
  0x55   : > { %386 = vlog2.f32 %v195_v0  ;;  %v202_v1 = vsub.f32 1.0, %v195_v0  ;;  %v201_v7 = vsub.f32 1.0, %v196_v3  ;;  %vm209_vm0 = vcmp.eq.f32.partialorder %v196_v3, 1.0  ;;  %s232_s29 = sshll.u32 %s194_s20, 4  ;;  %s709_s16 = scalar_lea.hbm %s753_s2, %s331_s14  ;;  %s704_s29 = int_to_ptr.vmem [resolvable:$true] %s232_s29 }
  0x56   : > { %v210_v14 = vsel %vm209_vm0, 5.0, %v524_v13  ;;  %s220_s24 = scalar_lea.sflag [#allocation4], %s689_s5  ;;  %s450_s17 = scalar_lea.vmem %s704_s29, 16 }
  0x57   : > { %388 = vlog2.f32 %v202_v1  ;;  %p451_p6 = scmp.ne.s32.totalorder %s704_s29, %s450_s17  ;;  %p766_p13 = scmp.ne.s32.totalorder %s758_s21, 0 }
  0x58   : > { %s525_s13 = smov [#allocation7]  }
  0x59   : > { %p452_p7 = pnand %p451_p6, %p766_p13  ;;  %s454_s19 = sshll.u32 %s525_s13, 4  ;;  %s455_s19 = int_to_ptr.vmem [resolvable:$false] %s454_s19 }
  0x5a   : > { %s456_s23 = scalar_lea.vmem %s455_s19, 32  ;;  %p457_p8 = scmp.lt.s32.totalorder %s704_s29, %s455_s19 }
  0x5b   : > { %p453_p5 = pneg %p452_p7  ;;  %p458_p9 = scmp.lt.s32.totalorder %s456_s23, %s450_s17 }
  0x5d   : > { %p459_p0 = por %p458_p9, %p457_p8 }
  0x5f   : > { %v387_v2 = vpop.eup %386  ;;  %p460_p1 = pnand %p459_p0, %p453_p5 }
  0x60   : > { %v198_v4 = vmul.f32 0.6931472, %v387_v2 }
  0x61   : > { %v389_v5 = vpop.eup %388 }
  0x62   : > { %v199_v6 = vmax.f32 %v198_v4, -100.0  ;;  %v204_v8 = vmul.f32 0.6931472, %v389_v5 }
  0x64   : > { %v200_v9 = vmul.f32 %v199_v6, %v196_v3  ;;  %v205_v10 = vmax.f32 %v204_v8, -100.0 }
  0x66   : > { %v206_v11 = vmul.f32 %v205_v10, %v201_v7 }
  0x68   : > { %v207_v12 = vadd.f32 %v206_v11, %v200_v9 }
  0x6a   : > { %v208_v15 = vsub.f32 0.0, %v207_v12 }
  0x6c   : > { %v211_v16 = vmul.f32 %v210_v14, %v208_v15 }
  0x6e   : > { %v212_v17 = vrot.slane %v211_v16, 4 }
  0x70   : > { %v213_v18 = vadd.f32 %v212_v17, %v211_v16 }
  0x72   : > { %v214_v19 = vrot.slane %v213_v18, 2 }
  0x74   : > { %v215_v20 = vadd.f32 %v214_v19, %v213_v18 }
  0x76   : > { %v216_v21 = vrot.slane %v215_v20, 1 }
  0x78   : > { %v217_v22 = vadd.f32 %v216_v21, %v215_v20 }
  0x7a   : > { %218 = vst [vmem:[%s194_s20] sm:$0x1] %v217_v22 }
  0x7b   : > { %463 = shalt.err (!%p460_p1)
}
  0x7c   : > { %s464_s25 = scalar_lea.hbm %s709_s16, 16  ;;  %s468_s5 = scalar_lea.hbm %s753_s2, 32 }
  0x7d   : > { %p465_p11 = scmp.ne.s32.totalorder %s709_s16, %s464_s25  ;;  %p469_p4 = scmp.lt.u32.totalorder %s709_s16, %s753_s2 }
  0x7e   : > { %p470_p10 = scmp.lt.u32.totalorder %s468_s5, %s464_s25  ;;  %p472_p6 = scmp.lt.u32.totalorder %s464_s25, %s709_s16 }
  0x7f   : > { %p466_p12 = pnand %p465_p11, %p766_p13 }
  0x80   : > { %p471_p3 = por %p470_p10, %p469_p4 }
  0x81   : > { %p467_p2 = pneg %p466_p12 }
  0x82   : > { %p473_p7 = por %p472_p6, %p471_p3 }
  0x84   : > { %p474_p5 = pnand %p473_p7, %p467_p2 }
  0x86   : > { %477 = shalt.err (!%p474_p5)
}
  0x87   : > { %338 = dma.vmem_to_hbm [thread:$0]  (%p766_p13), %s704_s29, 16, %s709_s16, %s220_s24  }
  0x88 PF: > { %s244_s30 = sand.u32 1, %s508_s9   ;;  %p767_p8 = scmp.ne.s32.totalorder %s759_s22, 0 }
  0x89   : > { %p768_p9 = scmp.ge.s32.totalorder %s520_s12, 2  ;;  %s245_s3 = scalar_lea.sflag [#allocation4], %s244_s30 }
  0x8b   : > { %p348_p0 = pnand %p768_p9, %p767_p8 }
  0x8d   : > { %503 = dma.done.wait (!%p348_p0), %s245_s3, 16  }
  0x8e   : > { %505 = vsyncadd (!%p348_p0), %s245_s3, 4294967280  ;;  %p18_p1 = scmp.ge.s32.totalorder %s566_s15, 4   ;;  %s769_s9 = smov %s512_s10 }
  0x8f   : > { %s770_s10 = smov %s516_s11  ;;  %s771_s11 = smov %s578_s18 }
  0x90   : > { %s772_s12 = smov %s566_s15  ;;  %20 = sbr.rel (!%p18_p1) target bundleno = 7 (0x7), region = 86 }
  0x97   :  { %249 = vsyncpa [#allocation3], 1 }
  0x98   :  { %251 = vsyncpa [#allocation3 + $0x1], 1 }
  0x99   :  { %252 = vsyncpa [#allocation6], 1 }
  0x9a   :  { %254 = vsyncpa [#allocation6 + $0x1], 1 }
  0x9b   :  { %255 = vsyncpa [#allocation4], 1 }
  0x9c   :  { %257 = vsyncpa [#allocation4 + $0x1], 1 }

</bundles_post_ra>
